<compile_context>
chip_gen: v7x
topology: tpu7x:2x2x1
jax: 0.10.0
libtpu: 0.0.40
codegen_flags: <defaults>
</compile_context>

<pallas_src>
import jax
import jax.numpy as jnp
from jax.experimental import pallas as pl
from jax.experimental.pallas import tpu as pltpu


def _cdiv(a, b):
    return (a + b - 1) // b


def _round_up(a, b):
    return _cdiv(a, b) * b


def valuenet_kernel(x_ref, w1_ref, b1_ref, w2_ref, b2_ref, o_ref):
    """One batch tile of relu(x @ W1 + b1) @ W2 + b2, lane-packed.

    x_ref : (TBr, P*S)  P samples packed per row (lane-dense)
    w1_ref: (P*S, P*H)  block-diagonal fc1 weights (VMEM resident)
    b1_ref: (1,   P*H)  fc1 bias tiled P times
    w2_ref: (P*H, P)    block-diagonal fc2 weights (VMEM resident)
    b2_ref: (1,)  SMEM  fc2 scalar bias
    o_ref : (TBr, P)    Q value of sample r*P + p at (r, p)
    """
    h = jnp.dot(x_ref[...], w1_ref[...], preferred_element_type=jnp.float32)
    h = jnp.maximum(h + b1_ref[...], 0.0)
    q = jnp.dot(h, w2_ref[...], preferred_element_type=jnp.float32) + b2_ref[0]
    o_ref[...] = q.astype(o_ref.dtype)


def value_net_forward(x, w1, b1, w2, b2, *, target_tile_samples=8192,
                      stream_vmem_budget=8 << 20):
    """x: (B, state_dim) f32; weights stored as (in_dim, out_dim).

    Returns (B, 1) f32, matching the PyTorch module's output.
    """
    B, S = x.shape
    H = w1.shape[1]

    # Lane packing factor: P samples share one 128-lane row when possible.
    P = 128 // S if (S < 128 and 128 % S == 0) else 1

    B_pad = _round_up(B, P)
    if B_pad != B:
        x = jnp.concatenate([x, jnp.zeros((B_pad - B, S), x.dtype)], axis=0)
    R = B_pad // P                      # packed rows
    xp = x.reshape(R, P * S)

    # Precompute block-diagonal packed weights (free, one-time wrapper work).
    eye = jnp.eye(P, dtype=w1.dtype)
    w1p = jnp.einsum("pq,sh->psqh", eye, w1).reshape(P * S, P * H)
    b1p = jnp.tile(b1, P).reshape(1, P * H)
    w2p = jnp.einsum("pq,h->qhp", eye, w2[:, 0]).reshape(P * H, P)
    b2s = b2.reshape(1)

    # ---- batch-row tile selection (VMEM-budgeted, balanced, >=2 steps) ----
    # Per packed row: double-buffered x + out blocks (lane-padded to >=128)
    # plus the fc1 activation temp, all f32.
    row_bytes = 4 * (2 * max(P * S, 128) + P * H + 2 * max(P, 128))
    max_rows = max(8, stream_vmem_budget // row_bytes)
    max_rows = min(max_rows, max(8, target_tile_samples // P))

    if R <= 8:
        TBr = R                          # tiny batch: one full block
        n_steps = 1
    else:
        # >=2 balanced steps so both v7x TensorCores get work; TBr is a
        # multiple of 8 (sublane) so only the final block is ever partial.
        n_steps = max(_cdiv(R, max_rows), 2)
        TBr = _round_up(_cdiv(R, n_steps), 8)
        n_steps = _cdiv(R, TBr)
    grid = (n_steps,)

    # Rough VMEM estimate -> explicit limit, capped at 32 MiB (safe on
    # v5e/v6e/v7x scoped defaults and physical capacities).
    weight_bytes = 4 * (P * S * P * H + P * H * P + P * H)
    est_vmem = 2 * weight_bytes + TBr * row_bytes
    vmem_limit = int(min(max(2 * est_vmem, 16 << 20), 32 << 20))

    cost = pl.CostEstimate(
        flops=2 * B_pad * S * H + 2 * B_pad * H,
        transcendentals=0,
        bytes_accessed=4 * (B_pad * S + S * H + H + H * 1 + 1 + B_pad),
    )

    out_packed = pl.pallas_call(
        valuenet_kernel,
        out_shape=jax.ShapeDtypeStruct((R, P), jnp.float32),
        grid=grid,
        in_specs=[
            # Streamed, lane-dense x tiles.
            pl.BlockSpec((TBr, P * S), lambda i: (i, 0)),
            # Packed weights/biases: constant index_map -> stay resident.
            pl.BlockSpec((P * S, P * H), lambda i: (0, 0)),
            pl.BlockSpec((1, P * H), lambda i: (0, 0)),
            pl.BlockSpec((P * H, P), lambda i: (0, 0)),
            # Scalar fc2 bias lives in SMEM.
            pl.BlockSpec(memory_space=pltpu.MemorySpace.SMEM),
        ],
        out_specs=pl.BlockSpec((TBr, P), lambda i: (i, 0)),
        compiler_params=pltpu.CompilerParams(
            dimension_semantics=("parallel",),
            vmem_limit_bytes=vmem_limit,
        ),
        cost_estimate=cost,
    )(xp, w1p, b1p, w2p, b2s)

    # Unpack: row r, lane p -> sample r*P + p; drop padded samples.
    return out_packed.reshape(B_pad, 1)[:B]


def init_params(key, state_dim, hidden_dim):
    """PyTorch-Linear-style uniform(+-1/sqrt(fan_in)) init.

    Weights are stored as (in_dim, out_dim) — transpose of PyTorch's layout —
    so the kernel can matmul directly.
    """
    k1, k2, k3, k4 = jax.random.split(key, 4)
    lim1 = 1.0 / jnp.sqrt(jnp.float32(state_dim))
    lim2 = 1.0 / jnp.sqrt(jnp.float32(hidden_dim))
    w1 = jax.random.uniform(k1, (state_dim, hidden_dim), jnp.float32, -lim1, lim1)
    b1 = jax.random.uniform(k2, (hidden_dim,), jnp.float32, -lim1, lim1)
    w2 = jax.random.uniform(k3, (hidden_dim, 1), jnp.float32, -lim2, lim2)
    b2 = jax.random.uniform(k4, (1,), jnp.float32, -lim2, lim2)
    return w1, b1, w2, b2


def _reference(x, w1, b1, w2, b2):
    return jnp.maximum(x @ w1 + b1, 0.0) @ w2 + b2


if __name__ == "__main__":
    key = jax.random.PRNGKey(0)
    k_p, k1, k2, k3, k_p2 = jax.random.split(key, 5)

    # Spec-sized config: state_dim=4, hidden_dim=32 (packed path, P=32).
    state_dim, hidden_dim = 4, 32
    w1, b1, w2, b2 = init_params(k_p, state_dim, hidden_dim)

    # Small batch: single-block path.
    x_small = jax.random.normal(k1, (8, state_dim), jnp.float32)
    out = jax.block_until_ready(value_net_forward(x_small, w1, b1, w2, b2))
    ref = _reference(x_small, w1, b1, w2, b2)
    assert out.shape == (8, 1)
    assert jnp.allclose(out, ref, atol=1e-5, rtol=1e-5)

    # Batch not a multiple of the pack factor or the tile: exercises padding,
    # the >=2-step "parallel" grid, and the masked tail block.
    x_mid = jax.random.normal(k2, (1000, state_dim), jnp.float32)
    out = jax.block_until_ready(value_net_forward(x_mid, w1, b1, w2, b2))
    ref = _reference(x_mid, w1, b1, w2, b2)
    assert out.shape == (1000, 1)
    assert jnp.allclose(out, ref, atol=1e-5, rtol=1e-5)

    # state_dim that does not divide 128 -> unpacked fallback path (P=1).
    state_dim2, hidden_dim2 = 5, 16
    w1b, b1b, w2b, b2b = init_params(k_p2, state_dim2, hidden_dim2)
    x_odd = jax.random.normal(k3, (16, state_dim2), jnp.float32)
    out = jax.block_until_ready(value_net_forward(x_odd, w1b, b1b, w2b, b2b))
    ref = _reference(x_odd, w1b, b1b, w2b, b2b)
    assert out.shape == (16, 1)
    assert jnp.allclose(out, ref, atol=1e-5, rtol=1e-5)

    print("KERNEL_OK")
</pallas_src>

<mosaic_0001>
module attributes {stable_mosaic.version = 11 : i64} {
  func.func @valuenet_kernel(%arg0: i32, %arg1: memref<1x128xf32, #tpu.memory_space<vmem>>, %arg2: memref<128x1024xf32, #tpu.memory_space<vmem>>, %arg3: memref<1x1024xf32, #tpu.memory_space<vmem>>, %arg4: memref<1024x32xf32, #tpu.memory_space<vmem>>, %arg5: memref<1xf32, #tpu.memory_space<smem>>, %arg6: memref<1x32xf32, #tpu.memory_space<vmem>>) attributes {dimension_semantics = [#tpu.dimension_semantics<parallel>], iteration_bounds = array<i64: 1>, scalar_prefetch = 0 : i64, scratch_operands = 0 : i64, tpu.core_type = #tpu.core_type<tc>, window_params = [{transform_indices = @transform_0, window_bounds = array<i64: 1, 128>}, {pipeline_mode = #tpu.pipeline_mode<synchronous>, transform_indices = @transform_1, window_bounds = array<i64: 128, 1024>}, {pipeline_mode = #tpu.pipeline_mode<synchronous>, transform_indices = @transform_2, window_bounds = array<i64: 1, 1024>}, {pipeline_mode = #tpu.pipeline_mode<synchronous>, transform_indices = @transform_3, window_bounds = array<i64: 1024, 32>}, {transform_indices = @transform_4, window_bounds = array<i64: 1>}, {transform_indices = @transform_5, window_bounds = array<i64: 1, 32>}]} {
    %c0 = arith.constant 0 : index
    %c0_0 = arith.constant 0 : index
    %0 = vector.load %arg1[%c0, %c0_0] : memref<1x128xf32, #tpu.memory_space<vmem>>, vector<1x128xf32>
    %c0_1 = arith.constant 0 : index
    %c0_2 = arith.constant 0 : index
    %1 = vector.load %arg2[%c0_1, %c0_2] : memref<128x1024xf32, #tpu.memory_space<vmem>>, vector<128x1024xf32>
    %cst = arith.constant dense<0.000000e+00> : vector<1x1024xf32>
    %2 = tpu.matmul %0, %1, %cst {dimension_numbers = #tpu.dot_dimension_numbers<[1], [0], [0], [1], [0, 0, 1, 1], [], []>} : vector<1x128xf32>, vector<128x1024xf32>, vector<1x1024xf32> -> vector<1x1024xf32>
    %c0_3 = arith.constant 0 : index
    %c0_4 = arith.constant 0 : index
    %3 = vector.load %arg3[%c0_3, %c0_4] : memref<1x1024xf32, #tpu.memory_space<vmem>>, vector<1x1024xf32>
    %4 = arith.addf %2, %3 : vector<1x1024xf32>
    %cst_5 = arith.constant 0.000000e+00 : f32
    %5 = vector.broadcast %cst_5 : f32 to vector<1x1024xf32>
    %6 = arith.maximumf %4, %5 : vector<1x1024xf32>
    %c0_6 = arith.constant 0 : index
    %c0_7 = arith.constant 0 : index
    %7 = vector.load %arg4[%c0_6, %c0_7] : memref<1024x32xf32, #tpu.memory_space<vmem>>, vector<1024x32xf32>
    %cst_8 = arith.constant dense<0.000000e+00> : vector<1x32xf32>
    %8 = tpu.matmul %6, %7, %cst_8 {dimension_numbers = #tpu.dot_dimension_numbers<[1], [0], [0], [1], [0, 0, 1, 1], [], []>} : vector<1x1024xf32>, vector<1024x32xf32>, vector<1x32xf32> -> vector<1x32xf32>
    %c0_9 = arith.constant 0 : index
    %9 = memref.load %arg5[%c0_9] : memref<1xf32, #tpu.memory_space<smem>>
    %10 = vector.broadcast %9 : f32 to vector<1x32xf32>
    %11 = arith.addf %8, %10 : vector<1x32xf32>
    %c0_10 = arith.constant 0 : index
    %c0_11 = arith.constant 0 : index
    %12 = vector.load %arg6[%c0_10, %c0_11] : memref<1x32xf32, #tpu.memory_space<vmem>>, vector<1x32xf32>
    tpu.vector_store %arg6[%c0_10, %c0_11], %11 {strides = array<i32>} : memref<1x32xf32, #tpu.memory_space<vmem>>, vector<1x32xf32>,
    return
  }
  func.func @transform_0(%arg0: i32) -> (i32, i32) {
    %c0_i32 = arith.constant 0 : i32
    %c0_i32_0 = arith.constant 0 : i32
    return %arg0, %c0_i32 : i32, i32
  }
  func.func @transform_1(%arg0: i32) -> (i32, i32) {
    %c0_i32 = arith.constant 0 : i32
    %c0_i32_0 = arith.constant 0 : i32
    %c0_i32_1 = arith.constant 0 : i32
    return %c0_i32, %c0_i32_0 : i32, i32
  }
  func.func @transform_2(%arg0: i32) -> (i32, i32) {
    %c0_i32 = arith.constant 0 : i32
    %c0_i32_0 = arith.constant 0 : i32
    %c0_i32_1 = arith.constant 0 : i32
    return %c0_i32, %c0_i32_0 : i32, i32
  }
  func.func @transform_3(%arg0: i32) -> (i32, i32) {
    %c0_i32 = arith.constant 0 : i32
    %c0_i32_0 = arith.constant 0 : i32
    %c0_i32_1 = arith.constant 0 : i32
    return %c0_i32, %c0_i32_0 : i32, i32
  }
  func.func @transform_4(%arg0: i32) -> i32 {
    %c0_i32 = arith.constant 0 : i32
    %c0_i32_0 = arith.constant 0 : i32
    return %c0_i32 : i32
  }
  func.func @transform_5(%arg0: i32) -> (i32, i32) {
    %c0_i32 = arith.constant 0 : i32
    %c0_i32_0 = arith.constant 0 : i32
    return %arg0, %c0_i32 : i32, i32
  }
}

</mosaic_0001>

<bundles_post_ra>
// kernel: tpu_custom_call.1
= control target key start
LH: loop header
LB: loop body
LE: loop exit
PB: predicated region body
PF: predicated region fallthrough
CT: control target
= control target key end

     0   :  { %v1333_v7 = vmov 0.0   ;;  %s2184_s0 = inlined_call_operand.vmem [shape: f32[1,128], index: 0, kind: input, shape index: {}]   ;;  %s2185_s1 = inlined_call_operand.vmem [shape: f32[128,1024], index: 1, kind: input, shape index: {}]   ;;  %s2186_s2 = inlined_call_operand.vmem [shape: f32[1,1024], index: 2, kind: input, shape index: {}]   ;;  %s2187_s3 = inlined_call_operand.vmem [shape: f32[1024,32], index: 3, kind: input, shape index: {}]   ;;  %s2188_s4 = inlined_call_operand.<no memory space> [shape: f32[1], index: 4, kind: input, shape index: {}]   ;;  %s2189_s5 = inlined_call_operand.hbm [shape: f32[1,32], index: 5, kind: output, shape index: {}]  }
   0x1   :  { %v24_v0 = vld [vmem:[%s2185_s1 + $0x8] sm:$0xff]  ;;  %v26_v2 = vld [vmem:[%s2185_s1 + $0x18] sm:$0xff]  ;;  %v23_v5 = vld [vmem:[%s2185_s1] sm:$0xff]  ;;  %257 = vmatprep.mubr.f32.mxu0 %v1333_v7  ;;  %328 = vmatprep.mubr.f32.mxu1 %v1333_v7 }
   0x2   :  { %v32_v1 = vld [vmem:[%s2185_s1 + $0x48] sm:$0xff]  ;;  %v34_v4 = vld [vmem:[%s2185_s1 + $0x58] sm:$0xff]  ;;  %v31_v6 = vld [vmem:[%s2185_s1 + $0x40] sm:$0xff] }
   0x3   :  { %v1051_v3 = vpack.c.bf16 %v32_v1, %v24_v0  ;;  %v1083_v8 = vpack.c.bf16 %v34_v4, %v26_v2  ;;  %v1053_v9 = vpack.c.bf16 %v31_v6, %v23_v5  ;;  %v25_v10 = vld [vmem:[%s2185_s1 + $0x10] sm:$0xff]  ;;  %v40_v12 = vld [vmem:[%s2185_s1 + $0x88] sm:$0xff]  ;;  %v42_v15 = vld [vmem:[%s2185_s1 + $0x98] sm:$0xff] }
   0x4   :  { %v33_v11 = vld [vmem:[%s2185_s1 + $0x50] sm:$0xff]  ;;  %v48_v14 = vld [vmem:[%s2185_s1 + $0xc8] sm:$0xff]  ;;  %v50_v16 = vld [vmem:[%s2185_s1 + $0xd8] sm:$0xff] }
   0x5   :  { %1052 = vmatprep.subr.bf16.mxu0 %v1051_v3  ;;  %v1085_v13 = vpack.c.bf16 %v33_v11, %v25_v10  ;;  %1084 = vmatprep.subr.bf16.mxu1 %v1083_v8  ;;  %v1055_v17 = vpack.c.bf16 %v48_v14, %v40_v12  ;;  %v1087_v18 = vpack.c.bf16 %v50_v16, %v42_v15  ;;  %v39_v19 = vld [vmem:[%s2185_s1 + $0x80] sm:$0xff]  ;;  %v41_v21 = vld [vmem:[%s2185_s1 + $0x90] sm:$0xff]  ;;  %v56_v24 = vld [vmem:[%s2185_s1 + $0x108] sm:$0xff] }
   0x6   :  { %1054 = vmatpush1.bf16.msra.mxu0 %v1053_v9  ;;  %v47_v20 = vld [vmem:[%s2185_s1 + $0xc0] sm:$0xff]  ;;  %v49_v23 = vld [vmem:[%s2185_s1 + $0xd0] sm:$0xff]  ;;  %v64_v25 = vld [vmem:[%s2185_s1 + $0x148] sm:$0xff] }
   0x7   :  { %1086 = vmatpush1.bf16.msra.mxu1 %v1085_v13  ;;  %v1057_v22 = vpack.c.bf16 %v47_v20, %v39_v19  ;;  %1056 = vmatprep.subr.bf16.mxu0 %v1055_v17  ;;  %v1089_v26 = vpack.c.bf16 %v49_v23, %v41_v21  ;;  %v1059_v27 = vpack.c.bf16 %v64_v25, %v56_v24  ;;  %v58_v28 = vld [vmem:[%s2185_s1 + $0x118] sm:$0xff]  ;;  %v55_v30 = vld [vmem:[%s2185_s1 + $0x100] sm:$0xff]  ;;  %v57_v33 = vld [vmem:[%s2185_s1 + $0x110] sm:$0xff] }
   0x8   :  { %1088 = vmatprep.subr.bf16.mxu1 %v1087_v18  ;;  %v66_v29 = vld [vmem:[%s2185_s1 + $0x158] sm:$0xff]  ;;  %v63_v32 = vld [vmem:[%s2185_s1 + $0x140] sm:$0xff]  ;;  %v65_v34 = vld [vmem:[%s2185_s1 + $0x150] sm:$0xff] }
   0x9   :  { %v1091_v31 = vpack.c.bf16 %v66_v29, %v58_v28  ;;  %v1061_v35 = vpack.c.bf16 %v63_v32, %v55_v30  ;;  %v72_v36 = vld [vmem:[%s2185_s1 + $0x188] sm:$0xff]  ;;  %v74_v38 = vld [vmem:[%s2185_s1 + $0x198] sm:$0xff]  ;;  %v1093_v39 = vpack.c.bf16 %v65_v34, %v57_v33  ;;  %v71_v42 = vld [vmem:[%s2185_s1 + $0x180] sm:$0xff] }
   0xa   :  { %1058 = vmatpush1.bf16.msra.mxu0 %v1057_v22  ;;  %v80_v37 = vld [vmem:[%s2185_s1 + $0x1c8] sm:$0xff]  ;;  %v82_v41 = vld [vmem:[%s2185_s1 + $0x1d8] sm:$0xff]  ;;  %v79_v43 = vld [vmem:[%s2185_s1 + $0x1c0] sm:$0xff] }
   0xb   :  { %1090 = vmatpush1.bf16.msra.mxu1 %v1089_v26  ;;  %1060 = vmatprep.subr.bf16.mxu0 %v1059_v27  ;;  %v1063_v40 = vpack.c.bf16 %v80_v37, %v72_v36  ;;  %v1095_v44 = vpack.c.bf16 %v82_v41, %v74_v38  ;;  %v73_v45 = vld [vmem:[%s2185_s1 + $0x190] sm:$0xff]  ;;  %v88_v47 = vld [vmem:[%s2185_s1 + $0x208] sm:$0xff]  ;;  %v90_v49 = vld [vmem:[%s2185_s1 + $0x218] sm:$0xff]  ;;  %v1065_v51 = vpack.c.bf16 %v79_v43, %v71_v42 }
   0xc   :  { %1092 = vmatprep.subr.bf16.mxu1 %v1091_v31  ;;  %v81_v46 = vld [vmem:[%s2185_s1 + $0x1d0] sm:$0xff]  ;;  %v96_v48 = vld [vmem:[%s2185_s1 + $0x248] sm:$0xff]  ;;  %v98_v50 = vld [vmem:[%s2185_s1 + $0x258] sm:$0xff] }
   0xd   :  { %v1097_v52 = vpack.c.bf16 %v81_v46, %v73_v45  ;;  %v1067_v53 = vpack.c.bf16 %v96_v48, %v88_v47  ;;  %v87_v54 = vld [vmem:[%s2185_s1 + $0x200] sm:$0xff]  ;;  %v89_v56 = vld [vmem:[%s2185_s1 + $0x210] sm:$0xff]  ;;  %v1099_v57 = vpack.c.bf16 %v98_v50, %v90_v49  ;;  %v104_v59 = vld [vmem:[%s2185_s1 + $0x288] sm:$0xff] }
   0xe   :  { %1062 = vmatpush1.bf16.msra.mxu0 %v1061_v35  ;;  %v95_v55 = vld [vmem:[%s2185_s1 + $0x240] sm:$0xff]  ;;  %v97_v58 = vld [vmem:[%s2185_s1 + $0x250] sm:$0xff]  ;;  %v112_v60 = vld [vmem:[%s2185_s1 + $0x2c8] sm:$0xff] }
   0xf   :  { %1094 = vmatpush1.bf16.msra.mxu1 %v1093_v39  ;;  %1064 = vmatprep.subr.bf16.mxu0 %v1063_v40  ;;  %v106_v61 = vld [vmem:[%s2185_s1 + $0x298] sm:$0xff]  ;;  %v1069_v63 = vpack.c.bf16 %v95_v55, %v87_v54  ;;  %v1101_v0 = vpack.c.bf16 %v97_v58, %v89_v56  ;;  %v1071_v1 = vpack.c.bf16 %v112_v60, %v104_v59  ;;  %v103_v2 = vld [vmem:[%s2185_s1 + $0x280] sm:$0xff]  ;;  %v105_v4 = vld [vmem:[%s2185_s1 + $0x290] sm:$0xff] }
  0x10   :  { %1096 = vmatprep.subr.bf16.mxu1 %v1095_v44  ;;  %v114_v62 = vld [vmem:[%s2185_s1 + $0x2d8] sm:$0xff]  ;;  %v111_v3 = vld [vmem:[%s2185_s1 + $0x2c0] sm:$0xff]  ;;  %v113_v6 = vld [vmem:[%s2185_s1 + $0x2d0] sm:$0xff] }
  0x11   :  { %v1103_v5 = vpack.c.bf16 %v114_v62, %v106_v61  ;;  %v120_v8 = vld [vmem:[%s2185_s1 + $0x308] sm:$0xff]  ;;  %v122_v10 = vld [vmem:[%s2185_s1 + $0x318] sm:$0xff]  ;;  %v1073_v12 = vpack.c.bf16 %v111_v3, %v103_v2  ;;  %v1105_v13 = vpack.c.bf16 %v113_v6, %v105_v4  ;;  %v119_v15 = vld [vmem:[%s2185_s1 + $0x300] sm:$0xff] }
  0x12   :  { %1066 = vmatpush1.bf16.msra.mxu0 %v1065_v51  ;;  %v128_v9 = vld [vmem:[%s2185_s1 + $0x348] sm:$0xff]  ;;  %v130_v11 = vld [vmem:[%s2185_s1 + $0x358] sm:$0xff]  ;;  %v127_v16 = vld [vmem:[%s2185_s1 + $0x340] sm:$0xff] }
  0x13   :  { %1098 = vmatpush1.bf16.msra.mxu1 %v1097_v52  ;;  %1068 = vmatprep.subr.bf16.mxu0 %v1067_v53  ;;  %v1075_v14 = vpack.c.bf16 %v128_v9, %v120_v8  ;;  %v121_v17 = vld [vmem:[%s2185_s1 + $0x310] sm:$0xff]  ;;  %v1107_v18 = vpack.c.bf16 %v130_v11, %v122_v10  ;;  %v136_v20 = vld [vmem:[%s2185_s1 + $0x388] sm:$0xff]  ;;  %v138_v22 = vld [vmem:[%s2185_s1 + $0x398] sm:$0xff]  ;;  %v1077_v24 = vpack.c.bf16 %v127_v16, %v119_v15 }
  0x14   :  { %1100 = vmatprep.subr.bf16.mxu1 %v1099_v57  ;;  %v129_v19 = vld [vmem:[%s2185_s1 + $0x350] sm:$0xff]  ;;  %v144_v21 = vld [vmem:[%s2185_s1 + $0x3c8] sm:$0xff]  ;;  %v146_v23 = vld [vmem:[%s2185_s1 + $0x3d8] sm:$0xff] }
  0x15   :  { %v1109_v25 = vpack.c.bf16 %v129_v19, %v121_v17  ;;  %v1079_v26 = vpack.c.bf16 %v144_v21, %v136_v20  ;;  %v135_v27 = vld [vmem:[%s2185_s1 + $0x380] sm:$0xff]  ;;  %v137_v29 = vld [vmem:[%s2185_s1 + $0x390] sm:$0xff]  ;;  %v1111_v30 = vpack.c.bf16 %v146_v23, %v138_v22  ;;  %v28_v32 = vld [vmem:[%s2185_s1 + $0x28] sm:$0xff] }
  0x16   :  { %1070 = vmatpush1.bf16.msra.mxu0 %v1069_v63  ;;  %v143_v28 = vld [vmem:[%s2185_s1 + $0x3c0] sm:$0xff]  ;;  %v145_v31 = vld [vmem:[%s2185_s1 + $0x3d0] sm:$0xff]  ;;  %v36_v33 = vld [vmem:[%s2185_s1 + $0x68] sm:$0xff] }
  0x17   :  { %1102 = vmatpush1.bf16.msra.mxu1 %v1101_v0  ;;  %1072 = vmatprep.subr.bf16.mxu0 %v1071_v1  ;;  %v30_v34 = vld [vmem:[%s2185_s1 + $0x38] sm:$0xff]  ;;  %v1081_v36 = vpack.c.bf16 %v143_v28, %v135_v27  ;;  %v1113_v37 = vpack.c.bf16 %v145_v31, %v137_v29  ;;  %v1115_v38 = vpack.c.bf16 %v36_v33, %v28_v32  ;;  %v27_v39 = vld [vmem:[%s2185_s1 + $0x20] sm:$0xff]  ;;  %v29_v41 = vld [vmem:[%s2185_s1 + $0x30] sm:$0xff] }
  0x18   :  { %1104 = vmatprep.subr.bf16.mxu1 %v1103_v5  ;;  %v38_v35 = vld [vmem:[%s2185_s1 + $0x78] sm:$0xff]  ;;  %v35_v40 = vld [vmem:[%s2185_s1 + $0x60] sm:$0xff]  ;;  %v37_v43 = vld [vmem:[%s2185_s1 + $0x70] sm:$0xff] }
  0x19   :  { %v1147_v42 = vpack.c.bf16 %v38_v35, %v30_v34  ;;  %v44_v44 = vld [vmem:[%s2185_s1 + $0xa8] sm:$0xff]  ;;  %v46_v46 = vld [vmem:[%s2185_s1 + $0xb8] sm:$0xff]  ;;  %v1598_v48 = vld [vmem:[%s2184_s0] sm:$0x1]  ;;  %v1117_v49 = vpack.c.bf16 %v35_v40, %v27_v39  ;;  %v1149_v50 = vpack.c.bf16 %v37_v43, %v29_v41 }
  0x1a   :  { %1074 = vmatpush1.bf16.msra.mxu0 %v1073_v12  ;;  %v52_v45 = vld [vmem:[%s2185_s1 + $0xe8] sm:$0xff]  ;;  %v54_v47 = vld [vmem:[%s2185_s1 + $0xf8] sm:$0xff]  ;;  %v43_v52 = vld [vmem:[%s2185_s1 + $0xa0] sm:$0xff] }
  0x1b   :  { %1106 = vmatpush1.bf16.msra.mxu1 %v1105_v13  ;;  %1076 = vmatprep.subr.bf16.mxu0 %v1075_v14  ;;  %v1119_v51 = vpack.c.bf16 %v52_v45, %v44_v44  ;;  %v51_v53 = vld [vmem:[%s2185_s1 + $0xe0] sm:$0xff]  ;;  %v45_v54 = vld [vmem:[%s2185_s1 + $0xb0] sm:$0xff]  ;;  %v1151_v55 = vpack.c.bf16 %v54_v47, %v46_v46  ;;  %v60_v57 = vld [vmem:[%s2185_s1 + $0x128] sm:$0xff] }
  0x1c   :  { %1108 = vmatprep.subr.bf16.mxu1 %v1107_v18  ;;  %v53_v56 = vld [vmem:[%s2185_s1 + $0xf0] sm:$0xff]  ;;  %v68_v58 = vld [vmem:[%s2185_s1 + $0x168] sm:$0xff]  ;;  %v62_v59 = vld [vmem:[%s2185_s1 + $0x138] sm:$0xff]  ;;  %v1121_v61 = vpack.c.bf16 %v51_v53, %v43_v52 }
  0x1d   :  { %v70_v60 = vld [vmem:[%s2185_s1 + $0x178] sm:$0xff]  ;;  %v1153_v62 = vpack.c.bf16 %v53_v56, %v45_v54  ;;  %v1123_v63 = vpack.c.bf16 %v68_v58, %v60_v57  ;;  %v59_v0 = vld [vmem:[%s2185_s1 + $0x120] sm:$0xff]  ;;  %v61_v2 = vld [vmem:[%s2185_s1 + $0x130] sm:$0xff] }
  0x1e   :  { %1078 = vmatpush1.bf16.msra.mxu0 %v1077_v24  ;;  %v67_v1 = vld [vmem:[%s2185_s1 + $0x160] sm:$0xff]  ;;  %v1155_v3 = vpack.c.bf16 %v70_v60, %v62_v59  ;;  %v69_v4 = vld [vmem:[%s2185_s1 + $0x170] sm:$0xff]  ;;  %v76_v5 = vld [vmem:[%s2185_s1 + $0x1a8] sm:$0xff] }
  0x1f   :  { %1110 = vmatpush1.bf16.msra.mxu1 %v1109_v25  ;;  %1080 = vmatprep.subr.bf16.mxu0 %v1079_v26  ;;  %v84_v6 = vld [vmem:[%s2185_s1 + $0x1e8] sm:$0xff]  ;;  %v78_v8 = vld [vmem:[%s2185_s1 + $0x1b8] sm:$0xff]  ;;  %v1125_v10 = vpack.c.bf16 %v67_v1, %v59_v0  ;;  %v1157_v11 = vpack.c.bf16 %v69_v4, %v61_v2  ;;  %v75_v13 = vld [vmem:[%s2185_s1 + $0x1a0] sm:$0xff] }
  0x20   :  { %1112 = vmatprep.subr.bf16.mxu1 %v1111_v30  ;;  %v86_v9 = vld [vmem:[%s2185_s1 + $0x1f8] sm:$0xff]  ;;  %v1127_v12 = vpack.c.bf16 %v84_v6, %v76_v5  ;;  %v83_v14 = vld [vmem:[%s2185_s1 + $0x1e0] sm:$0xff]  ;;  %v77_v15 = vld [vmem:[%s2185_s1 + $0x1b0] sm:$0xff] }
  0x21   :  { %v85_v16 = vld [vmem:[%s2185_s1 + $0x1f0] sm:$0xff]  ;;  %v92_v17 = vld [vmem:[%s2185_s1 + $0x228] sm:$0xff]  ;;  %v94_v19 = vld [vmem:[%s2185_s1 + $0x238] sm:$0xff]  ;;  %v1129_v21 = vpack.c.bf16 %v83_v14, %v75_v13 }
  0x22   :  { %1082 = vmatpush1.bf16.msra.mxu0 %v1081_v36  ;;  %v100_v18 = vld [vmem:[%s2185_s1 + $0x268] sm:$0xff]  ;;  %v102_v20 = vld [vmem:[%s2185_s1 + $0x278] sm:$0xff]  ;;  %v1161_v22 = vpack.c.bf16 %v85_v16, %v77_v15  ;;  %v91_v24 = vld [vmem:[%s2185_s1 + $0x220] sm:$0xff] }
  0x23   :  { %1114 = vmatpush1.bf16.msra.mxu1 %v1113_v37  ;;  %1116 = vmatprep.subr.bf16.mxu0 %v1115_v38  ;;  %v1131_v23 = vpack.c.bf16 %v100_v18, %v92_v17  ;;  %v99_v25 = vld [vmem:[%s2185_s1 + $0x260] sm:$0xff]  ;;  %v93_v26 = vld [vmem:[%s2185_s1 + $0x230] sm:$0xff]  ;;  %v1163_v27 = vpack.c.bf16 %v102_v20, %v94_v19  ;;  %v108_v29 = vld [vmem:[%s2185_s1 + $0x2a8] sm:$0xff] }
  0x24   :  { %1148 = vmatprep.subr.bf16.mxu1 %v1147_v42  ;;  %v101_v28 = vld [vmem:[%s2185_s1 + $0x270] sm:$0xff]  ;;  %v116_v30 = vld [vmem:[%s2185_s1 + $0x2e8] sm:$0xff]  ;;  %v110_v31 = vld [vmem:[%s2185_s1 + $0x2b8] sm:$0xff]  ;;  %v1133_v33 = vpack.c.bf16 %v99_v25, %v91_v24 }
  0x25   :  { %258 = vmatmul.mubr.f32.vlgmr.msra.gmra.mrb[0].mxu0 %v1598_v48  ;;  %v118_v32 = vld [vmem:[%s2185_s1 + $0x2f8] sm:$0xff]  ;;  %v1165_v34 = vpack.c.bf16 %v101_v28, %v93_v26  ;;  %v1135_v35 = vpack.c.bf16 %v116_v30, %v108_v29  ;;  %v107_v36 = vld [vmem:[%s2185_s1 + $0x2a0] sm:$0xff]  ;;  %v109_v38 = vld [vmem:[%s2185_s1 + $0x2b0] sm:$0xff] }
  0x26   :  { %329 = vmatmul.mubr.f32.vlgmr.msra.gmra.mrb[0].mxu1 %v1598_v48  ;;  %1118 = vmatpush1.bf16.msra.mxu0 %v1117_v49  ;;  %v115_v37 = vld [vmem:[%s2185_s1 + $0x2e0] sm:$0xff]  ;;  %v1167_v39 = vpack.c.bf16 %v118_v32, %v110_v31  ;;  %v117_v40 = vld [vmem:[%s2185_s1 + $0x2f0] sm:$0xff]  ;;  %v124_v41 = vld [vmem:[%s2185_s1 + $0x328] sm:$0xff] }
  0x27   :  { %1150 = vmatpush1.bf16.msra.mxu1 %v1149_v50  ;;  %1120 = vmatprep.subr.bf16.mxu0 %v1119_v51  ;;  %v132_v42 = vld [vmem:[%s2185_s1 + $0x368] sm:$0xff]  ;;  %v126_v43 = vld [vmem:[%s2185_s1 + $0x338] sm:$0xff]  ;;  %v1137_v45 = vpack.c.bf16 %v115_v37, %v107_v36  ;;  %v1169_v46 = vpack.c.bf16 %v117_v40, %v109_v38  ;;  %v123_v49 = vld [vmem:[%s2185_s1 + $0x320] sm:$0xff] }
  0x28   :  { %1152 = vmatprep.subr.bf16.mxu1 %v1151_v55  ;;  %399 = vmatprep.mubr.f32.mxu0 %v1333_v7  ;;  %v134_v44 = vld [vmem:[%s2185_s1 + $0x378] sm:$0xff]  ;;  %v1139_v47 = vpack.c.bf16 %v132_v42, %v124_v41  ;;  %v131_v50 = vld [vmem:[%s2185_s1 + $0x360] sm:$0xff]  ;;  %v125_v51 = vld [vmem:[%s2185_s1 + $0x330] sm:$0xff] }
  0x29   :  { %470 = vmatprep.mubr.f32.mxu1 %v1333_v7  ;;  %v1159_v7 = vpack.c.bf16 %v86_v9, %v78_v8  ;;  %v1171_v52 = vpack.c.bf16 %v134_v44, %v126_v43  ;;  %v133_v53 = vld [vmem:[%s2185_s1 + $0x370] sm:$0xff]  ;;  %v140_v54 = vld [vmem:[%s2185_s1 + $0x3a8] sm:$0xff]  ;;  %v142_v56 = vld [vmem:[%s2185_s1 + $0x3b8] sm:$0xff]  ;;  %v1141_v58 = vpack.c.bf16 %v131_v50, %v123_v49 }
  0x2a   :  { %1122 = vmatpush1.bf16.msra.mxu0 %v1121_v61  ;;  %v148_v55 = vld [vmem:[%s2185_s1 + $0x3e8] sm:$0xff]  ;;  %v150_v57 = vld [vmem:[%s2185_s1 + $0x3f8] sm:$0xff]  ;;  %v1173_v59 = vpack.c.bf16 %v133_v53, %v125_v51  ;;  %v139_v61 = vld [vmem:[%s2185_s1 + $0x3a0] sm:$0xff] }
  0x2b   :  { %1154 = vmatpush1.bf16.msra.mxu1 %v1153_v62  ;;  %1124 = vmatprep.subr.bf16.mxu0 %v1123_v63  ;;  %v1143_v60 = vpack.c.bf16 %v148_v55, %v140_v54  ;;  %v147_v62 = vld [vmem:[%s2185_s1 + $0x3e0] sm:$0xff]  ;;  %v141_v63 = vld [vmem:[%s2185_s1 + $0x3b0] sm:$0xff]  ;;  %v1175_v0 = vpack.c.bf16 %v150_v57, %v142_v56  ;;  %v534_v5 = vld [vmem:[%s2187_s3 + $0x188] sm:$0xff] }
  0x2c   :  { %1156 = vmatprep.subr.bf16.mxu1 %v1155_v3  ;;  %v149_v1 = vld [vmem:[%s2185_s1 + $0x3f0] sm:$0xff]  ;;  %v501_v2 = vld [vmem:[%s2187_s3 + $0x80] sm:$0xff]  ;;  %v502_v3 = vld [vmem:[%s2187_s3 + $0x88] sm:$0xff]  ;;  %v1145_v6 = vpack.c.bf16 %v147_v62, %v139_v61 }
  0x2d   :  { %v533_v4 = vld [vmem:[%s2187_s3 + $0x180] sm:$0xff] }
  0x2e   :  { %1126 = vmatpush1.bf16.msra.mxu0 %v1125_v10 }
  0x2f   :  { %1158 = vmatpush1.bf16.msra.mxu1 %v1157_v11  ;;  %1128 = vmatprep.subr.bf16.mxu0 %v1127_v12 }
  0x30   :  { %1160 = vmatprep.subr.bf16.mxu1 %v1159_v7 }
  0x32   :  { %1130 = vmatpush1.bf16.msra.mxu0 %v1129_v21 }
  0x33   :  { %1162 = vmatpush1.bf16.msra.mxu1 %v1161_v22  ;;  %1132 = vmatprep.subr.bf16.mxu0 %v1131_v23 }
  0x34   :  { %1164 = vmatprep.subr.bf16.mxu1 %v1163_v27 }
  0x36   :  { %1134 = vmatpush1.bf16.msra.mxu0 %v1133_v33 }
  0x37   :  { %1166 = vmatpush1.bf16.msra.mxu1 %v1165_v34  ;;  %1136 = vmatprep.subr.bf16.mxu0 %v1135_v35 }
  0x38   :  { %1168 = vmatprep.subr.bf16.mxu1 %v1167_v39 }
  0x3a   :  { %1138 = vmatpush1.bf16.msra.mxu0 %v1137_v45 }
  0x3b   :  { %1170 = vmatpush1.bf16.msra.mxu1 %v1169_v46  ;;  %1140 = vmatprep.subr.bf16.mxu0 %v1139_v47 }
  0x3c   :  { %1172 = vmatprep.subr.bf16.mxu1 %v1171_v52 }
  0x3e   :  { %1142 = vmatpush1.bf16.msra.mxu0 %v1141_v58 }
  0x3f   :  { %11 = vsyncpa [#allocation4], 0  ;;  %1174 = vmatpush1.bf16.msra.mxu1 %v1173_v59  ;;  %1144 = vmatprep.subr.bf16.mxu0 %v1143_v60  ;;  %v1177_v8 = vpack.c.bf16 %v149_v1, %v141_v63  ;;  %v1179_v9 = vpack.c.bf16 %v502_v3, %v501_v2  ;;  %v485_v10 = vld [vmem:[%s2187_s3] sm:$0xff]  ;;  %v486_v11 = vld [vmem:[%s2187_s3 + $0x8] sm:$0xff]  ;;  %v1211_v13 = vpack.c.bf16 %v534_v5, %v533_v4  ;;  %s1334_s6 = smov [#allocation3]   ;;  %vm895_vm0 = vcmask 253952  }
  0x40   :  { %v517_v12 = vld [vmem:[%s2187_s3 + $0x100] sm:$0xff]  ;;  %1176 = vmatprep.subr.bf16.mxu1 %v1175_v0  ;;  %v518_v14 = vld [vmem:[%s2187_s3 + $0x108] sm:$0xff]  ;;  %v503_v15 = vld [vmem:[%s2187_s3 + $0x90] sm:$0xff]  ;;  %v1181_v18 = vpack.c.bf16 %v486_v11, %v485_v10  ;;  %s903_s7 = sshll.u32 %s1334_s6, 4  ;;  %s904_s7 = int_to_ptr.vmem [resolvable:$true] %s903_s7 }
  0x41   :  { %v504_v7 = vld [vmem:[%s2187_s3 + $0x98] sm:$0xff]  ;;  %v535_v16 = vld [vmem:[%s2187_s3 + $0x190] sm:$0xff]  ;;  %v1213_v19 = vpack.c.bf16 %v518_v14, %v517_v12  ;;  %v505_v26 = vld [vmem:[%s2187_s3 + $0xa0] sm:$0xff]  ;;  %s1313_s8 = scalar_lea.vmem %s904_s7, 32  ;;  %p1314_p1 = scmp.lt.s32.totalorder %s904_s7, %s904_s7 }
  0x42   :  { %v536_v17 = vld [vmem:[%s2187_s3 + $0x198] sm:$0xff]  ;;  %1146 = vmatpush1.bf16.msra.mxu0 %v1145_v6  ;;  %v1183_v20 = vpack.c.bf16 %v504_v7, %v503_v15  ;;  %v487_v21 = vld [vmem:[%s2187_s3 + $0x10] sm:$0xff]  ;;  %v506_v27 = vld [vmem:[%s2187_s3 + $0xa8] sm:$0xff] }
  0x43   :  { %1178 = vmatpush1.bf16.msra.mxu1 %v1177_v8  ;;  %1180 = vmatprep.subr.bf16.mxu0 %v1179_v9  ;;  %v488_v22 = vld [vmem:[%s2187_s3 + $0x18] sm:$0xff]  ;;  %v519_v23 = vld [vmem:[%s2187_s3 + $0x110] sm:$0xff]  ;;  %v1215_v24 = vpack.c.bf16 %v536_v17, %v535_v16  ;;  %v537_v28 = vld [vmem:[%s2187_s3 + $0x1a0] sm:$0xff]  ;;  %v1187_v32 = vpack.c.bf16 %v506_v27, %v505_v26 }
  0x44   :  { %1212 = vmatprep.subr.bf16.mxu1 %v1211_v13  ;;  %v520_v25 = vld [vmem:[%s2187_s3 + $0x118] sm:$0xff]  ;;  %v538_v29 = vld [vmem:[%s2187_s3 + $0x1a8] sm:$0xff]  ;;  %v1185_v30 = vpack.c.bf16 %v488_v22, %v487_v21  ;;  %v489_v33 = vld [vmem:[%s2187_s3 + $0x20] sm:$0xff] }
  0x45   :  { %400 = vmatmul.mubr.f32.vlgmr.msra.gmra.mrb[2].mxu0 %v1598_v48  ;;  %v1217_v31 = vpack.c.bf16 %v520_v25, %v519_v23  ;;  %v490_v34 = vld [vmem:[%s2187_s3 + $0x28] sm:$0xff]  ;;  %v521_v35 = vld [vmem:[%s2187_s3 + $0x120] sm:$0xff]  ;;  %v507_v37 = vld [vmem:[%s2187_s3 + $0xb0] sm:$0xff] }
  0x46   :  { %471 = vmatmul.mubr.f32.vlgmr.msra.gmra.mrb[2].mxu1 %v1598_v48  ;;  %1182 = vmatpush3.bf16.msra.mxu0 %v1181_v18  ;;  %v1219_v48 = vpack.c.bf16 %v538_v29, %v537_v28  ;;  %v522_v36 = vld [vmem:[%s2187_s3 + $0x128] sm:$0xff]  ;;  %v508_v38 = vld [vmem:[%s2187_s3 + $0xb8] sm:$0xff]  ;;  %v539_v39 = vld [vmem:[%s2187_s3 + $0x1b0] sm:$0xff]  ;;  %v1189_v41 = vpack.c.bf16 %v490_v34, %v489_v33 }
  0x47   :  { %1214 = vmatpush3.bf16.msra.mxu1 %v1213_v19  ;;  %1184 = vmatprep.subr.bf16.mxu0 %v1183_v20  ;;  %v540_v40 = vld [vmem:[%s2187_s3 + $0x1b8] sm:$0xff]  ;;  %v1221_v42 = vpack.c.bf16 %v522_v36, %v521_v35  ;;  %v1191_v43 = vpack.c.bf16 %v508_v38, %v507_v37  ;;  %v491_v44 = vld [vmem:[%s2187_s3 + $0x30] sm:$0xff]  ;;  %v509_v50 = vld [vmem:[%s2187_s3 + $0xc0] sm:$0xff] }
  0x48   :  { %1216 = vmatprep.subr.bf16.mxu1 %v1215_v24  ;;  %v492_v45 = vld [vmem:[%s2187_s3 + $0x38] sm:$0xff]  ;;  %v523_v46 = vld [vmem:[%s2187_s3 + $0x130] sm:$0xff]  ;;  %v1223_v47 = vpack.c.bf16 %v540_v40, %v539_v39  ;;  %v510_v51 = vld [vmem:[%s2187_s3 + $0xc8] sm:$0xff] }
  0x49   :  { %v524_v49 = vld [vmem:[%s2187_s3 + $0x138] sm:$0xff]  ;;  %v541_v52 = vld [vmem:[%s2187_s3 + $0x1c0] sm:$0xff]  ;;  %v542_v53 = vld [vmem:[%s2187_s3 + $0x1c8] sm:$0xff]  ;;  %v1193_v54 = vpack.c.bf16 %v492_v45, %v491_v44  ;;  %v1195_v56 = vpack.c.bf16 %v510_v51, %v509_v50 }
  0x4a   :  { %1186 = vmatpush3.bf16.msra.mxu0 %v1185_v30  ;;  %v1225_v55 = vpack.c.bf16 %v524_v49, %v523_v46  ;;  %v493_v57 = vld [vmem:[%s2187_s3 + $0x40] sm:$0xff]  ;;  %v494_v58 = vld [vmem:[%s2187_s3 + $0x48] sm:$0xff]  ;;  %v1227_v60 = vpack.c.bf16 %v542_v53, %v541_v52  ;;  %v511_v62 = vld [vmem:[%s2187_s3 + $0xd0] sm:$0xff] }
  0x4b   :  { %1218 = vmatpush3.bf16.msra.mxu1 %v1217_v31  ;;  %1188 = vmatprep.subr.bf16.mxu0 %v1187_v32  ;;  %v525_v59 = vld [vmem:[%s2187_s3 + $0x140] sm:$0xff]  ;;  %v526_v61 = vld [vmem:[%s2187_s3 + $0x148] sm:$0xff]  ;;  %v512_v63 = vld [vmem:[%s2187_s3 + $0xd8] sm:$0xff]  ;;  %v1197_v2 = vpack.c.bf16 %v494_v58, %v493_v57 }
  0x4c   :  { %1220 = vmatprep.subr.bf16.mxu1 %v1219_v48  ;;  %v543_v0 = vld [vmem:[%s2187_s3 + $0x1d0] sm:$0xff]  ;;  %v544_v1 = vld [vmem:[%s2187_s3 + $0x1d8] sm:$0xff]  ;;  %v1229_v3 = vpack.c.bf16 %v526_v61, %v525_v59  ;;  %v1199_v4 = vpack.c.bf16 %v512_v63, %v511_v62  ;;  %v513_v11 = vld [vmem:[%s2187_s3 + $0xe0] sm:$0xff] }
  0x4d   :  { %v495_v5 = vld [vmem:[%s2187_s3 + $0x50] sm:$0xff]  ;;  %v496_v6 = vld [vmem:[%s2187_s3 + $0x58] sm:$0xff]  ;;  %v1231_v9 = vpack.c.bf16 %v544_v1, %v543_v0  ;;  %v514_v12 = vld [vmem:[%s2187_s3 + $0xe8] sm:$0xff] }
  0x4e   :  { %1190 = vmatpush3.bf16.msra.mxu0 %v1189_v41  ;;  %v527_v8 = vld [vmem:[%s2187_s3 + $0x150] sm:$0xff]  ;;  %v528_v10 = vld [vmem:[%s2187_s3 + $0x158] sm:$0xff]  ;;  %v545_v13 = vld [vmem:[%s2187_s3 + $0x1e0] sm:$0xff]  ;;  %v1201_v15 = vpack.c.bf16 %v496_v6, %v495_v5  ;;  %v1203_v16 = vpack.c.bf16 %v514_v12, %v513_v11  ;;  %v153_v41 = vlaneseq }
  0x4f   :  { %1222 = vmatpush3.bf16.msra.mxu1 %v1221_v42  ;;  %1192 = vmatprep.subr.bf16.mxu0 %v1191_v43  ;;  %v546_v14 = vld [vmem:[%s2187_s3 + $0x1e8] sm:$0xff]  ;;  %v1233_v7 = vpack.c.bf16 %v528_v10, %v527_v8  ;;  %v497_v18 = vld [vmem:[%s2187_s3 + $0x60] sm:$0xff]  ;;  %v515_v24 = vld [vmem:[%s2187_s3 + $0xf0] sm:$0xff] }
  0x50   :  { %1224 = vmatprep.subr.bf16.mxu1 %v1223_v47  ;;  %v1235_v17 = vpack.c.bf16 %v546_v14, %v545_v13  ;;  %v498_v19 = vld [vmem:[%s2187_s3 + $0x68] sm:$0xff]  ;;  %v529_v20 = vld [vmem:[%s2187_s3 + $0x160] sm:$0xff]  ;;  %v516_v25 = vld [vmem:[%s2187_s3 + $0xf8] sm:$0xff]  ;;  %v1966_v42 = vshrl.u32 %v153_v41, 7 }
  0x51   :  { %v1205_v21 = vpack.c.bf16 %v498_v19, %v497_v18  ;;  %v530_v22 = vld [vmem:[%s2187_s3 + $0x168] sm:$0xff]  ;;  %v547_v26 = vld [vmem:[%s2187_s3 + $0x1f0] sm:$0xff]  ;;  %v1207_v27 = vpack.c.bf16 %v516_v25, %v515_v24  ;;  %v548_v28 = vld [vmem:[%s2187_s3 + $0x1f8] sm:$0xff] }
  0x52   :  { %1194 = vmatpush3.bf16.msra.mxu0 %v1193_v54  ;;  %v1237_v23 = vpack.c.bf16 %v530_v22, %v529_v20  ;;  %v499_v29 = vld [vmem:[%s2187_s3 + $0x70] sm:$0xff]  ;;  %v500_v30 = vld [vmem:[%s2187_s3 + $0x78] sm:$0xff]  ;;  %v1239_v31 = vpack.c.bf16 %v548_v28, %v547_v26  ;;  %v565_v48 = vld [vmem:[%s2187_s3 + $0x280] sm:$0xff]  ;;  %v155_v43 = vsub.s32 0, %v1966_v42  ;;  %v163_v45 = vsub.s32 2, %v1966_v42 }
  0x53   :  { %1226 = vmatpush3.bf16.msra.mxu1 %v1225_v55  ;;  %1196 = vmatprep.subr.bf16.mxu0 %v1195_v56  ;;  %v1209_v32 = vpack.c.bf16 %v500_v30, %v499_v29  ;;  %v531_v33 = vld [vmem:[%s2187_s3 + $0x170] sm:$0xff]  ;;  %v532_v34 = vld [vmem:[%s2187_s3 + $0x178] sm:$0xff]  ;;  %v566_v36 = vld [vmem:[%s2187_s3 + $0x288] sm:$0xff]  ;;  %v159_v46 = vsub.s32 1, %v1966_v42  ;;  %v167_v47 = vsub.s32 3, %v1966_v42 }
  0x54   :  { %1228 = vmatprep.subr.bf16.mxu1 %v1227_v60  ;;  %v1241_v35 = vpack.c.bf16 %v532_v34, %v531_v33  ;;  %v597_v37 = vld [vmem:[%s2187_s3 + $0x380] sm:$0xff]  ;;  %v1243_v38 = vpack.c.bf16 %v566_v36, %v565_v48  ;;  %v598_v39 = vld [vmem:[%s2187_s3 + $0x388] sm:$0xff]  ;;  %v567_v0 = vld [vmem:[%s2187_s3 + $0x290] sm:$0xff] }
  0x55   :  { %v1275_v40 = vpack.c.bf16 %v598_v39, %v597_v37  ;;  %v1972_v44 = vld [vmem:[%s2186_s2] sm:$0xff]  ;;  %v550_v58 = vld [vmem:[%s2187_s3 + $0x208] sm:$0xff]  ;;  %v568_v1 = vld [vmem:[%s2187_s3 + $0x298] sm:$0xff] }
  0x56   :  { %1198 = vmatpush3.bf16.msra.mxu0 %v1197_v2  ;;  %v156_v49 = vrot.slane %v1972_v44, %v155_v43  ;;  %v164_v50 = vrot.slane %v1972_v44, %v163_v45  ;;  %v160_v51 = vrot.slane %v1972_v44, %v159_v46  ;;  %v168_v52 = vrot.slane %v1972_v44, %v167_v47  ;;  %v549_v57 = vld [vmem:[%s2187_s3 + $0x200] sm:$0xff]  ;;  %v582_v63 = vld [vmem:[%s2187_s3 + $0x308] sm:$0xff]  ;;  %v600_v5 = vld [vmem:[%s2187_s3 + $0x398] sm:$0xff] }
  0x57   :  { %1230 = vmatpush3.bf16.msra.mxu1 %v1229_v3  ;;  %1200 = vmatprep.subr.bf16.mxu0 %v1199_v4  ;;  %v581_v59 = vld [vmem:[%s2187_s3 + $0x300] sm:$0xff]  ;;  %v599_v4 = vld [vmem:[%s2187_s3 + $0x390] sm:$0xff]  ;;  %v1247_v12 = vpack.c.bf16 %v568_v1, %v567_v0  ;;  %v552_v14 = vld [vmem:[%s2187_s3 + $0x218] sm:$0xff] }
  0x58   :  { %1232 = vmatprep.subr.bf16.mxu1 %v1231_v9  ;;  %v1245_v9 = vpack.c.bf16 %v550_v58, %v549_v57  ;;  %v1277_v11 = vpack.c.bf16 %v582_v63, %v581_v59  ;;  %v551_v13 = vld [vmem:[%s2187_s3 + $0x210] sm:$0xff]  ;;  %v570_v18 = vld [vmem:[%s2187_s3 + $0x2a8] sm:$0xff]  ;;  %v601_v19 = vld [vmem:[%s2187_s3 + $0x3a0] sm:$0xff] }
  0x59   :  { %v602_v20 = vld [vmem:[%s2187_s3 + $0x3a8] sm:$0xff]  ;;  %v553_v24 = vld [vmem:[%s2187_s3 + $0x220] sm:$0xff]  ;;  %v571_v29 = vld [vmem:[%s2187_s3 + $0x2b0] sm:$0xff] }
  0x5a   :  { %1202 = vmatpush3.bf16.msra.mxu0 %v1201_v15  ;;  %v583_v15 = vld [vmem:[%s2187_s3 + $0x310] sm:$0xff]  ;;  %v554_v25 = vld [vmem:[%s2187_s3 + $0x228] sm:$0xff]  ;;  %v585_v26 = vld [vmem:[%s2187_s3 + $0x320] sm:$0xff] }
  0x5b   :  { %1234 = vmatpush3.bf16.msra.mxu1 %v1233_v7  ;;  %1204 = vmatprep.subr.bf16.mxu0 %v1203_v16  ;;  %v1279_v7 = vpack.c.bf16 %v600_v5, %v599_v4  ;;  %v584_v16 = vld [vmem:[%s2187_s3 + $0x318] sm:$0xff]  ;;  %v586_v28 = vld [vmem:[%s2187_s3 + $0x328] sm:$0xff]  ;;  %v1253_v33 = vpack.c.bf16 %v554_v25, %v553_v24  ;;  %v555_v48 = vld [vmem:[%s2187_s3 + $0x230] sm:$0xff] }
  0x5c   :  { %1236 = vmatprep.subr.bf16.mxu1 %v1235_v17  ;;  %v569_v17 = vld [vmem:[%s2187_s3 + $0x2a0] sm:$0xff]  ;;  %v1281_v22 = vpack.c.bf16 %v584_v16, %v583_v15  ;;  %v572_v30 = vld [vmem:[%s2187_s3 + $0x2b8] sm:$0xff]  ;;  %v1285_v34 = vpack.c.bf16 %v586_v28, %v585_v26  ;;  %v587_v37 = vld [vmem:[%s2187_s3 + $0x330] sm:$0xff] }
  0x5d   :  { %v556_v36 = vld [vmem:[%s2187_s3 + $0x238] sm:$0xff]  ;;  %v574_v41 = vld [vmem:[%s2187_s3 + $0x2c8] sm:$0xff]  ;;  %v605_v43 = vld [vmem:[%s2187_s3 + $0x3c0] sm:$0xff] }
  0x5e   :  { %1206 = vmatpush3.bf16.msra.mxu0 %v1205_v21  ;;  %v1249_v21 = vpack.c.bf16 %v552_v14, %v551_v13  ;;  %v588_v39 = vld [vmem:[%s2187_s3 + $0x338] sm:$0xff]  ;;  %v606_v45 = vld [vmem:[%s2187_s3 + $0x3c8] sm:$0xff]  ;;  %v1257_v46 = vpack.c.bf16 %v556_v36, %v555_v48  ;;  %v607_v57 = vld [vmem:[%s2187_s3 + $0x3d0] sm:$0xff] }
  0x5f   :  { %1238 = vmatpush3.bf16.msra.mxu1 %v1237_v23  ;;  %1208 = vmatprep.subr.bf16.mxu0 %v1207_v27  ;;  %v1251_v23 = vpack.c.bf16 %v570_v18, %v569_v17  ;;  %v1283_v27 = vpack.c.bf16 %v602_v20, %v601_v19  ;;  %v1289_v47 = vpack.c.bf16 %v588_v39, %v587_v37  ;;  %v608_v58 = vld [vmem:[%s2187_s3 + $0x3d8] sm:$0xff]  ;;  %v591_v0 = vld [vmem:[%s2187_s3 + $0x350] sm:$0xff]  ;;  %v578_v4 = vld [vmem:[%s2187_s3 + $0x2e8] sm:$0xff]  ;;  %v175_v17 = vsub.s32 5, %v1966_v42 }
  0x60   :  { %1240 = vmatprep.subr.bf16.mxu1 %v1239_v31  ;;  %v603_v31 = vld [vmem:[%s2187_s3 + $0x3b0] sm:$0xff]  ;;  %v560_v63 = vld [vmem:[%s2187_s3 + $0x258] sm:$0xff]  ;;  %v1295_v1 = vpack.c.bf16 %v608_v58, %v607_v57  ;;  %v609_v5 = vld [vmem:[%s2187_s3 + $0x3e0] sm:$0xff]  ;;  %v183_v20 = vsub.s32 7, %v1966_v42 }
  0x61   :  { %v562_v13 = vld [vmem:[%s2187_s3 + $0x268] sm:$0xff]  ;;  %v593_v14 = vld [vmem:[%s2187_s3 + $0x360] sm:$0xff]  ;;  %v579_v18 = vld [vmem:[%s2187_s3 + $0x2f0] sm:$0xff] }
  0x62   :  { %1210 = vmatpush3.bf16.msra.mxu0 %v1209_v32  ;;  %v604_v32 = vld [vmem:[%s2187_s3 + $0x3b8] sm:$0xff]  ;;  %v594_v16 = vld [vmem:[%s2187_s3 + $0x368] sm:$0xff] }
  0x63   :  { %1242 = vmatpush3.bf16.msra.mxu1 %v1241_v35  ;;  %1244 = vmatprep.subr.bf16.mxu0 %v1243_v38  ;;  %v1255_v35 = vpack.c.bf16 %v572_v30, %v571_v29  ;;  %v1287_v38 = vpack.c.bf16 %v604_v32, %v603_v31  ;;  %v580_v19 = vld [vmem:[%s2187_s3 + $0x2f8] sm:$0xff]  ;;  %v1301_v25 = vpack.c.bf16 %v594_v16, %v593_v14  ;;  %v595_v31 = vld [vmem:[%s2187_s3 + $0x370] sm:$0xff] }
  0x64   :  { %1276 = vmatprep.subr.bf16.mxu1 %v1275_v40  ;;  %v573_v40 = vld [vmem:[%s2187_s3 + $0x2c0] sm:$0xff]  ;;  %v1271_v26 = vpack.c.bf16 %v580_v19, %v579_v18  ;;  %v176_v29 = vrot.slane %v1972_v44, %v175_v17  ;;  %v596_v32 = vld [vmem:[%s2187_s3 + $0x378] sm:$0xff] }
  0xf8   :  { %v259_v53 = vpop.f32.mrb[0].mxu0 }
  0xf9   :  { %v260_v54 = vadd.f32 %v259_v53, %v156_v49  ;;  %v330_v55 = vpop.f32.mrb[0].mxu1  ;;  %v261_v56 = vpop.f32.mrb[1].mxu0  ;;  %v1259_v49 = vpack.c.bf16 %v574_v41, %v573_v40  ;;  %v1291_v53 = vpack.c.bf16 %v606_v45, %v605_v43 }
  0xfa   :  { %v331_v60 = vadd.f32 %v330_v55, %v164_v50  ;;  %v262_v61 = vadd.f32 %v261_v56, %v160_v51  ;;  %v332_v62 = vpop.f32.mrb[1].mxu1  ;;  %v557_v50 = vld [vmem:[%s2187_s3 + $0x240] sm:$0xff]  ;;  %v558_v51 = vld [vmem:[%s2187_s3 + $0x248] sm:$0xff]  ;;  %v575_v55 = vld [vmem:[%s2187_s3 + $0x2d0] sm:$0xff] }
  0xfb   :  { %v477_v2 = vmax.f32 %v260_v54, 0.0  ;;  %v333_v3 = vadd.f32 %v332_v62, %v168_v52  ;;  %v589_v52 = vld [vmem:[%s2187_s3 + $0x340] sm:$0xff]  ;;  %v590_v54 = vld [vmem:[%s2187_s3 + $0x348] sm:$0xff]  ;;  %v576_v56 = vld [vmem:[%s2187_s3 + $0x2d8] sm:$0xff]  ;;  %v1261_v59 = vpack.c.bf16 %v558_v51, %v557_v50  ;;  %v614_v51 = vstv %s2188_s4  ;;  %s1309_s4 = scalar_lea.vmem %s904_s7, 16 }
  0xfc   :  { %v479_v6 = vmax.f32 %v331_v60, 0.0  ;;  %v478_v8 = vmax.f32 %v262_v61, 0.0  ;;  %v1293_v60 = vpack.c.bf16 %v590_v54, %v589_v52  ;;  %v1263_v61 = vpack.c.bf16 %v576_v56, %v575_v55  ;;  %v559_v62 = vld [vmem:[%s2187_s3 + $0x250] sm:$0xff]  ;;  %p1310_p0 = scmp.ne.s32.totalorder %s904_s7, %s1309_s4  ;;  %p1315_p2 = scmp.lt.s32.totalorder %s1313_s8, %s1309_s4 }
  0xfd   :  { %v480_v10 = vmax.f32 %v333_v3, 0.0  ;;  %v577_v3 = vld [vmem:[%s2187_s3 + $0x2e0] sm:$0xff] }
  0xfe   :  { %679 = vmatprep.mubr.f32.mxu0 %v478_v8  ;;  %v1265_v8 = vpack.c.bf16 %v560_v63, %v559_v62  ;;  %p1316_p3 = por %p1315_p2, %p1314_p1 }
  0xff   :  { %749 = vmatprep.mubr.f32.mxu1 %v480_v10  ;;  %680 = vmatmul.mubr.f32.vlgmr.msra.gmra.mrb[4].mxu0 %v477_v2  ;;  %v592_v2 = vld [vmem:[%s2187_s3 + $0x358] sm:$0xff]  ;;  %v1267_v10 = vpack.c.bf16 %v578_v4, %v577_v3 }
 0x100   :  { %750 = vmatmul.mubr.f32.vlgmr.msra.gmra.mrb[4].mxu1 %v479_v6  ;;  %1246 = vmatpush3.bf16.msra.mxu0 %v1245_v9  ;;  %v610_v6 = vld [vmem:[%s2187_s3 + $0x3e8] sm:$0xff]  ;;  %v1297_v9 = vpack.c.bf16 %v592_v2, %v591_v0  ;;  %p1317_p4 = pnand %p1316_p3, %p1310_p0 }
 0x101   :  { %1278 = vmatpush3.bf16.msra.mxu1 %v1277_v11  ;;  %1248 = vmatprep.subr.bf16.mxu0 %v1247_v12  ;;  %v171_v11 = vsub.s32 4, %v1966_v42  ;;  %v561_v12 = vld [vmem:[%s2187_s3 + $0x260] sm:$0xff]  ;;  %v1299_v15 = vpack.c.bf16 %v610_v6, %v609_v5 }
 0x102   :  { %1280 = vmatprep.subr.bf16.mxu1 %v1279_v7  ;;  %v179_v7 = vsub.s32 6, %v1966_v42  ;;  %v563_v42 = vld [vmem:[%s2187_s3 + $0x270] sm:$0xff] }
 0x103   :  { %v172_v24 = vrot.slane %v1972_v44, %v171_v11 }
 0x104   :  { %1250 = vmatpush3.bf16.msra.mxu0 %v1249_v21  ;;  %v611_v21 = vld [vmem:[%s2187_s3 + $0x3f0] sm:$0xff]  ;;  %v180_v28 = vrot.slane %v1972_v44, %v179_v7 }
 0x105   :  { %1282 = vmatpush3.bf16.msra.mxu1 %v1281_v22  ;;  %1252 = vmatprep.subr.bf16.mxu0 %v1251_v23  ;;  %v612_v22 = vld [vmem:[%s2187_s3 + $0x3f8] sm:$0xff]  ;;  %v1269_v23 = vpack.c.bf16 %v562_v13, %v561_v12 }
 0x106   :  { %1284 = vmatprep.subr.bf16.mxu1 %v1283_v27  ;;  %v564_v27 = vld [vmem:[%s2187_s3 + $0x278] sm:$0xff]  ;;  %v1303_v30 = vpack.c.bf16 %v612_v22, %v611_v21 }
 0x108   :  { %1254 = vmatpush3.bf16.msra.mxu0 %v1253_v33  ;;  %v184_v33 = vrot.slane %v1972_v44, %v183_v20 }
 0x109   :  { %1286 = vmatpush3.bf16.msra.mxu1 %v1285_v34  ;;  %1256 = vmatprep.subr.bf16.mxu0 %v1255_v35  ;;  %v1273_v35 = vpack.c.bf16 %v564_v27, %v563_v42 }
 0x10a   :  { %1288 = vmatprep.subr.bf16.mxu1 %v1287_v38  ;;  %v1305_v38 = vpack.c.bf16 %v596_v32, %v595_v31 }
 0x10c   :  { %1258 = vmatpush3.bf16.msra.mxu0 %v1257_v46 }
 0x10d   :  { %1290 = vmatpush3.bf16.msra.mxu1 %v1289_v47  ;;  %1260 = vmatprep.subr.bf16.mxu0 %v1259_v49 }
 0x10e   :  { %1292 = vmatprep.subr.bf16.mxu1 %v1291_v53 }
 0x110   :  { %1262 = vmatpush3.bf16.msra.mxu0 %v1261_v59 }
 0x111   :  { %1294 = vmatpush3.bf16.msra.mxu1 %v1293_v60  ;;  %1264 = vmatprep.subr.bf16.mxu0 %v1263_v61 }
 0x112   :  { %1296 = vmatprep.subr.bf16.mxu1 %v1295_v1 }
 0x114   :  { %1266 = vmatpush3.bf16.msra.mxu0 %v1265_v8 }
 0x115   :  { %1298 = vmatpush3.bf16.msra.mxu1 %v1297_v9  ;;  %1268 = vmatprep.subr.bf16.mxu0 %v1267_v10 }
 0x116   :  { %1300 = vmatprep.subr.bf16.mxu1 %v1299_v15 }
 0x118   :  { %v401_v34 = vpop.f32.mrb[2].mxu0  ;;  %1270 = vmatpush3.bf16.msra.mxu0 %v1269_v23 }
 0x119   :  { %v402_v48 = vadd.f32 %v401_v34, %v172_v24  ;;  %v472_v36 = vpop.f32.mrb[2].mxu1  ;;  %1302 = vmatpush3.bf16.msra.mxu1 %v1301_v25  ;;  %v403_v37 = vpop.f32.mrb[3].mxu0  ;;  %1272 = vmatprep.subr.bf16.mxu0 %v1271_v26 }
 0x11a   :  { %v473_v39 = vadd.f32 %v472_v36, %v180_v28  ;;  %v404_v40 = vadd.f32 %v403_v37, %v176_v29  ;;  %v474_v41 = vpop.f32.mrb[3].mxu1  ;;  %1304 = vmatprep.subr.bf16.mxu1 %v1303_v30 }
 0x11b   :  { %v475_v43 = vadd.f32 %v474_v41, %v184_v33  ;;  %v481_v47 = vmax.f32 %v402_v48, 0.0 }
 0x11c   :  { %v483_v45 = vmax.f32 %v473_v39, 0.0  ;;  %v482_v46 = vmax.f32 %v404_v40, 0.0  ;;  %1274 = vmatpush3.bf16.msra.mxu0 %v1273_v35 }
 0x11d   :  { %v484_v49 = vmax.f32 %v475_v43, 0.0  ;;  %1306 = vmatpush3.bf16.msra.mxu1 %v1305_v38 }
 0x11e   :  { %819 = vmatprep.mubr.f32.mxu0 %v482_v46 }
 0x11f   :  { %889 = vmatprep.mubr.f32.mxu1 %v484_v49  ;;  %820 = vmatmul.mubr.f32.vlgmr.msra.gmra.mrb[6].mxu0 %v481_v47 }
 0x120   :  { %890 = vmatmul.mubr.f32.vlgmr.msra.gmra.mrb[6].mxu1 %v483_v45 }
 0x1d2   :  { %v943_v44 = vpop.f32.mrb[4].mxu0 }
 0x1d3   :  { %v978_v50 = vpop.f32.mrb[4].mxu1  ;;  %v944_v52 = vpop.f32.mrb[5].mxu0 }
 0x1d4   :  { %v945_v53 = vadd.f32 %v944_v52, %v943_v44  ;;  %v979_v54 = vpop.f32.mrb[5].mxu1 }
 0x1d5   :  { %v980_v55 = vadd.f32 %v979_v54, %v978_v50 }
 0x1d6   :  { %v682_v56 = vadd.f32 %v945_v53, %v614_v51 }
 0x1d8   :  { %v752_v57 = vadd.f32 %v980_v55, %v682_v56 }
 0x1f2   :  { %v1013_v58 = vpop.f32.mrb[6].mxu0 }
 0x1f3   :  { %v1048_v59 = vpop.f32.mrb[6].mxu1  ;;  %v1014_v60 = vpop.f32.mrb[7].mxu0 }
 0x1f4   :  { %v1015_v61 = vadd.f32 %v1014_v60, %v1013_v58  ;;  %v1049_v62 = vpop.f32.mrb[7].mxu1 }
 0x1f5   :  { %v1050_v63 = vadd.f32 %v1049_v62, %v1048_v59 }
 0x1f6   :  { %v822_v0 = vadd.f32 %v1015_v61, %v752_v57 }
 0x1f8   :  { %v892_v1 = vadd.f32 %v1050_v63, %v822_v0 }
 0x1fa   :  { %896 = vst.msk [vmem:[#allocation3] sm:$0x1] %vm895_vm0, %v892_v1 }
 0x1fb   :  { %1320 = shalt.err (!%p1317_p4)
}
 0x1fc   :  { %s1321_s11 = scalar_lea.hbm %s2189_s5, 16 }
 0x1fd   :  { %p1322_p5 = scmp.ne.s32.totalorder %s2189_s5, %s1321_s11  ;;  %p1325_p6 = scmp.lt.u32.totalorder %s1321_s11, %s2189_s5 }
 0x1ff   :  { %p1327_p7 = pnand %p1325_p6, %p1322_p5 }
 0x201   :  { %1330 = shalt.err (!%p1327_p7)
}
 0x202   :  { %906 = dma.vmem_to_hbm [thread:$0]  %s904_s7, 16, %s2189_s5, [#allocation4]  }
 0x203   :  { %1331 = dma.done.wait [#allocation4], 16  }
 0x204   :  { %1332 = vsyncadd [#allocation4], 4294967280 }
 0x205   :  { %910 = vsyncpa [#allocation4], 1 }

</bundles_post_ra>
